<compile_context>
chip_gen: v6e
topology: v6e:2x2x1
jax: 0.10.0
libtpu: 0.0.40
codegen_flags: <defaults>
</compile_context>

<pallas_src>
import jax
import jax.numpy as jnp
from jax import lax
from jax.experimental import pallas as pl
from jax.experimental.pallas import tpu as pltpu

IMG = 7
N_CHANN = 1
K = 3
OUT_HW = IMG - K + 1                      # 5
LIN_IN = N_CHANN * OUT_HW * OUT_HW        # 25
N_IN_FLAT = N_CHANN * IMG * IMG           # 49
N_OUT = 2


def net_kernel(x_ref, w_ref, b_ref, out_ref):
    # x_ref:   (tb, 49) f32   batch tile of flattened images (untransposed)
    # w_ref:   (49, 2)  f32   folded (conv o linear) weight, VMEM-resident
    # b_ref:   (1, 2)   f32   folded bias, VMEM-resident
    # out_ref: (tb, 2)  f32
    acc = jnp.dot(x_ref[...], w_ref[...], preferred_element_type=jnp.float32)
    out_ref[...] = (acc + b_ref[...]).astype(out_ref.dtype)


def _round_up(x, m):
    return ((x + m - 1) // m) * m


def _fold_params(conv_w, conv_b, lin_w, lin_b):
    """Fold Conv2d(1,1,3) + Linear(25,2) into a single affine map on (B,49)."""
    conv_w = conv_w.astype(jnp.float32)
    lin_w = lin_w.astype(jnp.float32)
    # Push the 49x49 identity through the (bias-free) conv to get its Jacobian,
    # then compose with the linear weight.  One-time, tiny (49 x 1 x 7 x 7).
    eye = jnp.eye(N_IN_FLAT, dtype=jnp.float32).reshape(N_IN_FLAT, N_CHANN, IMG, IMG)
    conv_jac = lax.conv_general_dilated(
        eye, conv_w, window_strides=(1, 1), padding="VALID",
        dimension_numbers=("NCHW", "OIHW", "NCHW"))        # (49, 1, 5, 5)
    w_eff = conv_jac.reshape(N_IN_FLAT, LIN_IN) @ lin_w.T  # (49, 2)
    b_eff = conv_b.astype(jnp.float32).reshape(()) * lin_w.sum(axis=1) \
        + lin_b.astype(jnp.float32)                        # (2,)
    return w_eff, b_eff


def net_forward(x_nchw, conv_w, conv_b, lin_w, lin_b, *, block_b=16384):
    """x_nchw: (B, 1, 7, 7).  Returns (B, 2), matching PyTorch Net_AutoGrad."""
    B = x_nchw.shape[0]
    x_flat = x_nchw.astype(jnp.float32).reshape(B, N_IN_FLAT)   # (B, 49), C == 1

    w_eff, b_eff = _fold_params(conv_w, conv_b, lin_w, lin_b)
    b_row = b_eff.reshape(1, N_OUT)                             # (1, 2)

    # Batch tile selection:
    #  * small B: a single full-extent block (always a legal block shape).
    #  * large B: multiple of 128, capped by block_b (VMEM budget) and by
    #    ceil(B/2) so the grid has >= 2 steps (both v7x TensorCores used).
    #    Sweep block_b in 8192..32768 per generation if tuning further.
    block_b = max(128, _round_up(block_b, 128))
    if B <= 256:
        tb = B
    else:
        tb = max(128, min(block_b, _round_up(pl.cdiv(B, 2), 128)))
    grid = (pl.cdiv(B, tb),)   # trailing partial block handled by Pallas clipping

    # Double-buffered (tb, 49) input and (tb, 2) output tiles both lane-pad to
    # 128 in VMEM -> ~4 * tb * 512 B.  Raise the scoped limit accordingly
    # (v5e default is 16 MiB, v6e/v7x 32 MiB); cap at 48 MiB (v7x has 64 MiB).
    vmem_need = 4 * tb * 128 * 4 + (2 << 20)
    vmem_limit = min(max(vmem_need, 16 << 20), 48 << 20)

    out = pl.pallas_call(
        net_kernel,
        out_shape=jax.ShapeDtypeStruct((B, N_OUT), jnp.float32),
        grid=grid,
        in_specs=[
            pl.BlockSpec((tb, N_IN_FLAT), lambda i: (i, 0)),     # streamed batch tile
            pl.BlockSpec((N_IN_FLAT, N_OUT), lambda i: (0, 0)),  # resident weight
            pl.BlockSpec((1, N_OUT), lambda i: (0, 0)),          # resident bias
        ],
        out_specs=pl.BlockSpec((tb, N_OUT), lambda i: (i, 0)),
        compiler_params=pltpu.CompilerParams(
            dimension_semantics=("parallel",),
            vmem_limit_bytes=vmem_limit),
        cost_estimate=pl.CostEstimate(
            flops=2 * B * N_IN_FLAT * N_OUT,
            transcendentals=0,
            bytes_accessed=(B * N_IN_FLAT + B * N_OUT
                            + N_IN_FLAT * N_OUT + N_OUT) * 4),
    )(x_flat, w_eff, b_row)

    return out                                                   # (B, 2)


def reference_forward(x_nchw, conv_w, conv_b, lin_w, lin_b):
    """Pure-JAX reference matching PyTorch semantics (NCHW, valid conv)."""
    y = lax.conv_general_dilated(
        x_nchw.astype(jnp.float32), conv_w.astype(jnp.float32),
        window_strides=(1, 1), padding="VALID",
        dimension_numbers=("NCHW", "OIHW", "NCHW"))
    y = y + conv_b.reshape(1, N_CHANN, 1, 1)
    y = y.reshape(x_nchw.shape[0], -1)             # torch.flatten(x, 1)
    return y @ lin_w.T + lin_b


if __name__ == "__main__":
    # Deterministic parameter init (PyTorch default: U(-1/sqrt(fan_in), +1/sqrt(fan_in)))
    k1, k2, k3, k4, kx, kx2 = jax.random.split(jax.random.PRNGKey(0), 6)
    conv_bound = 1.0 / (N_CHANN * K * K) ** 0.5
    lin_bound = 1.0 / LIN_IN ** 0.5
    conv_w = jax.random.uniform(k1, (N_CHANN, N_CHANN, K, K),
                                minval=-conv_bound, maxval=conv_bound,
                                dtype=jnp.float32)
    conv_b = jax.random.uniform(k2, (N_CHANN,),
                                minval=-conv_bound, maxval=conv_bound,
                                dtype=jnp.float32)
    lin_w = jax.random.uniform(k3, (N_OUT, LIN_IN),
                               minval=-lin_bound, maxval=lin_bound,
                               dtype=jnp.float32)
    lin_b = jax.random.uniform(k4, (N_OUT,),
                               minval=-lin_bound, maxval=lin_bound,
                               dtype=jnp.float32)

    # Small deterministic input, batch=2, NCHW (B, 1, 7, 7)
    x = jax.random.normal(kx, (2, N_CHANN, IMG, IMG), dtype=jnp.float32)
    out = jax.block_until_ready(net_forward(x, conv_w, conv_b, lin_w, lin_b))
    ref = reference_forward(x, conv_w, conv_b, lin_w, lin_b)
    assert out.shape == (2, N_OUT)
    assert jnp.allclose(out, ref, atol=1e-5, rtol=1e-5), (out, ref)

    # Larger batch: exercises the multi-step grid with a partial trailing block
    # (resident weights + boundary clipping), still cheap.
    x_big = jax.random.normal(kx2, (500, N_CHANN, IMG, IMG), dtype=jnp.float32)
    out_big = jax.block_until_ready(net_forward(x_big, conv_w, conv_b, lin_w, lin_b))
    ref_big = reference_forward(x_big, conv_w, conv_b, lin_w, lin_b)
    assert out_big.shape == (500, N_OUT)
    assert jnp.allclose(out_big, ref_big, atol=1e-5, rtol=1e-5)

    print("KERNEL_OK")
</pallas_src>

<mosaic_0001>
module attributes {stable_mosaic.version = 11 : i64} {
  func.func @net_kernel(%arg0: i32, %arg1: memref<2x49xf32, #tpu.memory_space<vmem>>, %arg2: memref<49x2xf32, #tpu.memory_space<vmem>>, %arg3: memref<1x2xf32, #tpu.memory_space<vmem>>, %arg4: memref<2x2xf32, #tpu.memory_space<vmem>>) attributes {dimension_semantics = [#tpu.dimension_semantics<parallel>], iteration_bounds = array<i64: 1>, scalar_prefetch = 0 : i64, scratch_operands = 0 : i64, tpu.core_type = #tpu.core_type<tc>, window_params = [{transform_indices = @transform_0, window_bounds = array<i64: 2, 49>}, {pipeline_mode = #tpu.pipeline_mode<synchronous>, transform_indices = @transform_1, window_bounds = array<i64: 49, 2>}, {pipeline_mode = #tpu.pipeline_mode<synchronous>, transform_indices = @transform_2, window_bounds = array<i64: 1, 2>}, {transform_indices = @transform_3, window_bounds = array<i64: 2, 2>}]} {
    %c0 = arith.constant 0 : index
    %c0_0 = arith.constant 0 : index
    %0 = vector.load %arg1[%c0, %c0_0] : memref<2x49xf32, #tpu.memory_space<vmem>>, vector<2x49xf32>
    %c0_1 = arith.constant 0 : index
    %c0_2 = arith.constant 0 : index
    %1 = vector.load %arg2[%c0_1, %c0_2] : memref<49x2xf32, #tpu.memory_space<vmem>>, vector<49x2xf32>
    %cst = arith.constant dense<0.000000e+00> : vector<2x2xf32>
    %2 = tpu.matmul %0, %1, %cst {dimension_numbers = #tpu.dot_dimension_numbers<[1], [0], [0], [1], [0, 0, 1, 1], [], []>} : vector<2x49xf32>, vector<49x2xf32>, vector<2x2xf32> -> vector<2x2xf32>
    %c0_3 = arith.constant 0 : index
    %c0_4 = arith.constant 0 : index
    %3 = vector.load %arg3[%c0_3, %c0_4] : memref<1x2xf32, #tpu.memory_space<vmem>>, vector<1x2xf32>
    %4 = vector.broadcast %3 : vector<1x2xf32> to vector<2x2xf32>
    %5 = arith.addf %2, %4 : vector<2x2xf32>
    %c0_5 = arith.constant 0 : index
    %c0_6 = arith.constant 0 : index
    %6 = vector.load %arg4[%c0_5, %c0_6] : memref<2x2xf32, #tpu.memory_space<vmem>>, vector<2x2xf32>
    tpu.vector_store %arg4[%c0_5, %c0_6], %5 {strides = array<i32>} : memref<2x2xf32, #tpu.memory_space<vmem>>, vector<2x2xf32>,
    return
  }
  func.func @transform_0(%arg0: i32) -> (i32, i32) {
    %c0_i32 = arith.constant 0 : i32
    %c0_i32_0 = arith.constant 0 : i32
    return %arg0, %c0_i32 : i32, i32
  }
  func.func @transform_1(%arg0: i32) -> (i32, i32) {
    %c0_i32 = arith.constant 0 : i32
    %c0_i32_0 = arith.constant 0 : i32
    %c0_i32_1 = arith.constant 0 : i32
    return %c0_i32, %c0_i32_0 : i32, i32
  }
  func.func @transform_2(%arg0: i32) -> (i32, i32) {
    %c0_i32 = arith.constant 0 : i32
    %c0_i32_0 = arith.constant 0 : i32
    %c0_i32_1 = arith.constant 0 : i32
    return %c0_i32, %c0_i32_0 : i32, i32
  }
  func.func @transform_3(%arg0: i32) -> (i32, i32) {
    %c0_i32 = arith.constant 0 : i32
    %c0_i32_0 = arith.constant 0 : i32
    return %arg0, %c0_i32 : i32, i32
  }
}

</mosaic_0001>

<bundles_post_ra>
// kernel: tpu_custom_call.1
= control target key start
LH: loop header
LB: loop body
LE: loop exit
PB: predicated region body
PF: predicated region fallthrough
CT: control target
= control target key end

     0   :  { %vm34_vm0 = vcmask 1040384   ;;  %v177_v1 = vmov 0.0   ;;  %vm178_vm1 = vmmov 0   ;;  %s230_s0 = inlined_call_operand.vmem [shape: f32[2,49], index: 0, kind: input, shape index: {}]   ;;  %s231_s1 = inlined_call_operand.vmem [shape: f32[49,2], index: 1, kind: input, shape index: {}]   ;;  %s232_s2 = inlined_call_operand.vmem [shape: f32[1,2], index: 2, kind: input, shape index: {}]   ;;  %s233_s3 = inlined_call_operand.hbm [shape: f32[2,2], index: 3, kind: output, shape index: {}]  }
   0x1   :  { %v22_v0 = vld [vmem:[%s231_s1 + $0x30] sm:$0x1]  ;;  %135 = vmatprep.subr.mxu0 %v177_v1  ;;  %v21_v2 = vld [vmem:[%s231_s1 + $0x28] sm:$0xff]  ;;  %149 = vmatprep.mubr.msk.f32.mxu0 %vm178_vm1, %v177_v1  ;;  %v20_v3 = vld [vmem:[%s231_s1 + $0x20] sm:$0xff] }
   0x2   :  { %136 = vmatpush3.msk.msra.mxu0 %vm34_vm0, %v22_v0 }
   0x3   :  { %137 = vmatprep.subr.mxu0 %v177_v1 }
   0x4   :  { %8 = vsyncpa [#allocation3], 0  ;;  %138 = vmatpush3.msra.mxu0 %v21_v2  ;;  %v19_v4 = vld [vmem:[%s231_s1 + $0x18] sm:$0xff]  ;;  %v18_v5 = vld [vmem:[%s231_s1 + $0x10] sm:$0xff]  ;;  %vm30_vm2 = vcmask 400384   ;;  %s179_s30 = smov [#allocation2]  }
   0x5   :  { %139 = vmatprep.subr.mxu0 %v177_v1  ;;  %v17_v6 = vld [vmem:[%s231_s1 + $0x8] sm:$0xff]  ;;  %v16_v7 = vld [vmem:[%s231_s1] sm:$0xff]  ;;  %s116_s4 = sshll.u32 %s179_s30, 4  ;;  %vm108_vm3 = vcmask 9216   ;;  %s117_s4 = int_to_ptr.vmem [resolvable:$true] %s116_s4 }
   0x6   :  { %140 = vmatpush3.msra.mxu0 %v20_v3  ;;  %v15_v8 = vld [vmem:[%s230_s0] sm:$0x3]  ;;  %s155_s1 = scalar_lea.vmem %s117_s4, 32  ;;  %p160_p1 = scmp.lt.s32.totalorder %s117_s4, %s117_s4 }
   0x7   :  { %141 = vmatprep.subr.mxu0 %v177_v1  ;;  %v124_v9 = vld [vmem:[%s232_s2] ss:$0 sm:$0xff]  ;;  %p156_p0 = scmp.ne.s32.totalorder %s117_s4, %s155_s1  ;;  %p161_p2 = scmp.lt.s32.totalorder %s155_s1, %s155_s1 }
   0x8   :  { %142 = vmatpush3.msra.mxu0 %v19_v4 }
   0x9   :  { %143 = vmatprep.subr.mxu0 %v177_v1  ;;  %p162_p3 = por %p161_p2, %p160_p1 }
   0xa   :  { %144 = vmatpush3.msra.mxu0 %v18_v5 }
   0xb   :  { %145 = vmatprep.subr.mxu0 %v177_v1  ;;  %p163_p4 = pnand %p162_p3, %p156_p0 }
   0xc   :  { %146 = vmatpush3.msra.mxu0 %v17_v6 }
   0xd   :  { %147 = vmatprep.subr.mxu0 %v177_v1 }
   0xe   :  { %148 = vmatpush3.msra.mxu0 %v16_v7 }
   0xf   :  { %150 = vmatmul.mubr.msk.f32.vlgmr.msra.gmra.mxu0 %vm30_vm2, %v15_v8 }
  0xcf   :  { %v104_v10 = vpop.f32.mrf.mxu0 }
  0xd0   :  { %v105_v11 = vadd.f32 %v124_v9, %v104_v10 }
  0xd1   :  { %v151_v12 = vpop.f32.mrf.mxu0 }
  0xd2   :  { %109 = vst.msk [vmem:[#allocation2] sm:$0x3] %vm108_vm3, %v105_v11 }
  0xd3   :  { %166 = shalt.err (!%p163_p4)
}
  0xd4   :  { %119 = dma.vmem_to_hbm [thread:$0]  %s117_s4, 32, %s233_s3, [#allocation3]  }
  0xd5   :  { %175 = dma.done.wait [#allocation3], 32  }
  0xd6   :  { %176 = vsyncadd [#allocation3], 4294967264 }
  0xd7   :  { %123 = vsyncpa [#allocation3], 1 }

</bundles_post_ra>
